<compile_context>
chip_gen: v7x
topology: tpu7x:2x2x1
jax: 0.10.0
libtpu: 0.0.40
codegen_flags: <defaults>
</compile_context>

<pallas_src>
import functools

import jax
import jax.numpy as jnp
from jax import lax
from jax.experimental import pallas as pl
from jax.experimental.pallas import tpu as pltpu

LANES = 128
SUBLANES = 8
_MAX_BLOCK_ROWS = 8192        # (8192,128) f32 = 4 MiB per input per pipeline buffer
_CHUNK_ROWS = 512             # in-kernel accumulation chunk (bounds VMEM temporaries)
_VMEM_LIMIT_BYTES = 32 * 1024 * 1024


def _round_up(x, m):
    return -(-x // m) * m


@functools.lru_cache(maxsize=None)
def _core_split_config():
    """(num_core_splits, use_core_parallel) for the local TPU generation."""
    kind = ""
    try:
        kind = jax.devices()[0].device_kind.lower()
    except Exception:  # pragma: no cover - defensive
        pass
    if "v7" in kind:      # 2 TensorCores per chip -> shard the split axis across them
        return 2, True
    if "v4" in kind:      # megacore: plain "parallel" shards across the 2 TCs
        return 2, False
    return 1, False       # v5e / v6e: single TensorCore


def _loss_reduce_kernel(pred_ref, tgt_ref, out_ref, *, valid_rows, chunk_rows,
                        needs_mask):
    """Accumulate per-lane sum((p-t)^2) / sum(|p-t|) into a resident (16,128) block.

    out_ref rows [0:8) hold the SSE partials, rows [8:16) the SAE partials for
    this core split.  Grid = (core_split, row_block); the row_block axis is the
    reduction axis (same output block index -> accumulator stays in VMEM).
    """
    block_rows = pred_ref.shape[0]
    num_chunks = block_rows // chunk_rows
    groups = chunk_rows // SUBLANES

    @pl.when(pl.program_id(1) == 0)
    def _():
        out_ref[...] = jnp.zeros_like(out_ref)

    if needs_mask:
        # Logical row offset of this block in the full slab (ragged tail rows
        # delivered by Pallas are unspecified and must be masked off).
        inner = pl.num_programs(1)
        block_row0 = (pl.program_id(0) * inner + pl.program_id(1)) * block_rows
        row_iota = lax.broadcasted_iota(jnp.int32, (chunk_rows, LANES), 0)

    def chunk_body(c, carry):
        sse, sae = carry
        r0 = pl.multiple_of(c * chunk_rows, chunk_rows)
        p = pred_ref[pl.ds(r0, chunk_rows), :].astype(jnp.float32)
        t = tgt_ref[pl.ds(r0, chunk_rows), :].astype(jnp.float32)
        d = p - t
        if needs_mask:
            global_row = block_row0 + r0 + row_iota
            d = jnp.where(global_row < valid_rows, d, 0.0)
        # (chunk,128) -> (chunk/8, 8, 128) is a free, layout-preserving reshape;
        # the axis-0 sum is pure VALU work (no per-chunk cross-lane reduce).
        sse = sse + jnp.sum((d * d).reshape(groups, SUBLANES, LANES), axis=0)
        sae = sae + jnp.sum(jnp.abs(d).reshape(groups, SUBLANES, LANES), axis=0)
        return sse, sae

    zeros = jnp.zeros((SUBLANES, LANES), jnp.float32)
    sse, sae = lax.fori_loop(0, num_chunks, chunk_body, (zeros, zeros),
                             unroll=True)
    out_ref[0:SUBLANES, :] += sse
    out_ref[SUBLANES:2 * SUBLANES, :] += sae


@functools.partial(
    jax.jit,
    static_argnames=("n_valid", "splits", "inner", "block_rows", "chunk_rows",
                     "needs_mask", "core_parallel"),
)
def _mse_mae(pred2d, tgt2d, *, n_valid, splits, inner, block_rows, chunk_rows,
             needs_mask, core_parallel):
    """Returns a (2,) f32 device array [mse, mae] for the given lane slabs."""
    rows = pred2d.shape[0]
    nblocks = -(-rows // block_rows)      # number of blocks touching valid rows

    def in_map(s, i):
        # Clamp so an overhanging (fully masked) block never indexes past the
        # array; its contribution is zeroed by the in-kernel row mask, which is
        # based on the *logical* block position, not the clamped one.
        return (jnp.minimum(s * inner + i, nblocks - 1), 0)

    kernel = functools.partial(
        _loss_reduce_kernel,
        valid_rows=rows, chunk_rows=chunk_rows, needs_mask=needs_mask)

    if splits > 1:
        split_sem = (getattr(pltpu, "CORE_PARALLEL", pltpu.PARALLEL)
                     if core_parallel else pltpu.PARALLEL)
    else:
        split_sem = pltpu.ARBITRARY

    partials = pl.pallas_call(
        kernel,
        out_shape=jax.ShapeDtypeStruct((splits, 2 * SUBLANES, LANES),
                                       jnp.float32),
        grid_spec=pltpu.PrefetchScalarGridSpec(
            num_scalar_prefetch=0,
            grid=(splits, inner),
            in_specs=[
                pl.BlockSpec((block_rows, LANES), in_map),
                pl.BlockSpec((block_rows, LANES), in_map),
            ],
            out_specs=pl.BlockSpec((None, 2 * SUBLANES, LANES),
                                   lambda s, i: (s, 0, 0)),
        ),
        compiler_params=pltpu.CompilerParams(
            dimension_semantics=(split_sem, pltpu.ARBITRARY),
            vmem_limit_bytes=_VMEM_LIMIT_BYTES,
        ),
    )(pred2d, tgt2d)

    # Single tiny epilogue reduce: (splits, 2, 8, 128) -> (2,) = [sse, sae].
    sums = jnp.sum(partials.reshape(splits, 2, SUBLANES, LANES), axis=(0, 2, 3))
    return sums / jnp.float32(n_valid)    # -> (2,) [mse, mae]


def _as_lane_slab(x):
    """Flatten to a lane-dense [rows, 128] slab. Zero-copy when numel % 128 == 0."""
    flat = jnp.ravel(x)
    n = flat.shape[0]
    rem = (-n) % LANES
    if rem:
        # TODO(synk): truly ragged (numel % 128 != 0) inputs take one extra
        # <=127-element pad pass; all other shapes stream with no extra copy.
        flat = jnp.pad(flat, (0, rem))
    return flat.reshape(flat.shape[0] // LANES, LANES), n


def _plan(rows):
    """Static tiling plan (all Python ints / bools -> jit static args)."""
    max_splits, core_parallel = _core_split_config()
    splits = max_splits if rows >= max_splits * _CHUNK_ROWS else 1
    per_split = -(-rows // splits)
    if per_split <= _CHUNK_ROWS:
        block_rows = _round_up(per_split, SUBLANES)
        chunk_rows = block_rows
    else:
        block_rows = min(_MAX_BLOCK_ROWS, _round_up(per_split, _CHUNK_ROWS))
        chunk_rows = _CHUNK_ROWS
    inner = -(-per_split // block_rows)
    needs_mask = splits * inner * block_rows != rows
    return dict(splits=splits, inner=inner, block_rows=block_rows,
                chunk_rows=chunk_rows, needs_mask=needs_mask,
                core_parallel=core_parallel and splits > 1)


class LossModulePallas:
    """JAX/Pallas equivalent of vis4d LossModule (MSE + L1 instantiation)."""

    def __init__(self, losses, exclude_attributes=None, sync_metrics=True):
        self.losses = []
        if not isinstance(losses, list):
            losses = [losses]
        for loss in losses:
            assert "loss" in loss, "Loss definition must contain a loss."
            assert "connector" in loss, "Loss definition must contain a connector."
            loss = dict(loss)
            if "name" not in loss:
                loss["name"] = loss.get("loss_name", str(loss["loss"]))
            if "weight" not in loss:
                loss["weight"] = 1.0
            self.losses.append(loss)
        self.exclude_attributes = exclude_attributes
        # When False, metrics are returned as device scalars (no per-step host
        # sync) so the loss can overlap with the rest of the training step.
        self.sync_metrics = sync_metrics

    def __call__(self, output, batch):
        loss_dict = {}
        reduce_cache = {}   # (id(pred), id(target)) -> (mse, mae) device scalars
        for loss in self.losses:
            kwargs = loss["connector"](output, batch)
            pred, target = kwargs["input"], kwargs["target"]
            cache_key = (id(pred), id(target))
            if cache_key not in reduce_cache:
                pred2d, n = _as_lane_slab(pred)
                tgt2d, n_t = _as_lane_slab(target)
                assert n == n_t, "input / target element counts must match"
                means = _mse_mae(pred2d, tgt2d, n_valid=n,
                                 **_plan(pred2d.shape[0]))
                reduce_cache[cache_key] = (means[0], means[1])
            mse, mae = reduce_cache[cache_key]

            kind = loss["loss"]
            if kind == "mse":
                value = mse
            elif kind == "l1":
                value = mae
            else:
                # TODO(synk): only MSE / L1 (the docstring instantiation) are
                # lowered to the Pallas reduction; arbitrary nn.Module losses /
                # nested-dict or namedtuple loss outputs are not translated.
                raise ValueError(f"Unknown loss {kind!r}")

            name = loss["name"]
            weight = loss["weight"]
            loss_weight = (weight.get(name, 1.0) if isinstance(weight, dict)
                           else weight)
            key = name
            while key in loss_dict:
                key = "__" + key
            loss_dict[key] = jnp.float32(loss_weight) * value

        keep_loss_dict = {
            k: v for k, v in loss_dict.items()
            if self.exclude_attributes is None or k not in self.exclude_attributes
        }
        total_loss = (sum(keep_loss_dict.values()) if keep_loss_dict
                      else jnp.float32(0.0))

        if self.sync_metrics:
            # One batched host transfer for all metrics (reference semantics:
            # metrics are python floats).
            host = jax.device_get({"losses": loss_dict, "total": total_loss})
            metrics = {k: float(v) for k, v in host["losses"].items()}
            metrics["loss"] = float(host["total"])
        else:
            metrics = dict(loss_dict)
            metrics["loss"] = total_loss
        return total_loss, metrics


def _pred_target_connector(output, batch):
    return {"input": output["input"], "target": batch["target"]}


def _make_module():
    return LossModulePallas(
        [
            {
                "loss": "mse",
                "loss_name": "MSELoss",
                "weight": 0.7,
                "connector": _pred_target_connector,
            },
            {
                "loss": "l1",
                "loss_name": "L1Loss",
                "weight": 0.3,
                "connector": _pred_target_connector,
            },
        ]
    )


def _check(pred, target, loss_module):
    total_loss, metrics = loss_module({"input": pred}, {"target": target})
    total_loss = jax.block_until_ready(total_loss)
    d = pred.astype(jnp.float32) - target.astype(jnp.float32)
    ref_total = 0.7 * jnp.mean(d * d) + 0.3 * jnp.mean(jnp.abs(d))
    assert jnp.allclose(total_loss, ref_total, rtol=1e-5, atol=1e-6), (
        total_loss, ref_total)
    assert abs(metrics["loss"] - float(total_loss)) < 1e-6


if __name__ == "__main__":
    key = jax.random.PRNGKey(0)
    k1, k2, k3, k4 = jax.random.split(key, 4)

    loss_module = _make_module()

    # Primary small-shape check (batch=2, channels=4, spatial=16).
    B, C, H, W = 2, 4, 16, 16
    pred = jax.random.normal(k1, (B, C, H, W), dtype=jnp.float32)
    target = jax.random.normal(k2, (B, C, H, W), dtype=jnp.float32)
    _check(pred, target, loss_module)

    # Secondary check exercising the ragged-tail (in-kernel mask) path.
    pred2 = jax.random.normal(k3, (2, 4, 200, 200), dtype=jnp.float32)
    target2 = jax.random.normal(k4, (2, 4, 200, 200), dtype=jnp.float32)
    _check(pred2, target2, loss_module)

    print("KERNEL_OK")
</pallas_src>

<mosaic_0001>
module attributes {stable_mosaic.version = 11 : i64} {
  func.func @_loss_reduce_kernel(%arg0: i32, %arg1: i32, %arg2: memref<16x128xf32, #tpu.memory_space<vmem>>, %arg3: memref<16x128xf32, #tpu.memory_space<vmem>>, %arg4: memref<1x16x128xf32, #tpu.memory_space<vmem>>) attributes {dimension_semantics = [#tpu.dimension_semantics<arbitrary>, #tpu.dimension_semantics<arbitrary>], iteration_bounds = array<i64: 1, 1>, scalar_prefetch = 0 : i64, scratch_operands = 0 : i64, tpu.core_type = #tpu.core_type<tc>, window_params = [{transform_indices = @transform_0, window_bounds = array<i64: 16, 128>}, {transform_indices = @transform_1, window_bounds = array<i64: 16, 128>}, {transform_indices = @transform_2, window_bounds = array<i64: 1, 16, 128>}]} {
    %c0_i32 = arith.constant 0 : i32
    %0 = arith.cmpi eq, %arg1, %c0_i32 : i32
    %1 = arith.extui %0 : i1 to i32
    %c0_i32_0 = arith.constant 0 : i32
    %2 = arith.cmpi ne, %1, %c0_i32_0 : i32
    scf.if %2 {
      %cst_16 = arith.constant 0.000000e+00 : f32
      %31 = vector.broadcast %cst_16 : f32 to vector<16x128xf32>
      %c0_17 = arith.constant 0 : index
      %c0_18 = arith.constant 0 : index
      %c0_19 = arith.constant 0 : index
      %32 = vector.load %arg4[%c0_17, %c0_18, %c0_19] : memref<1x16x128xf32, #tpu.memory_space<vmem>>, vector<1x16x128xf32>
      %33 = vector.shape_cast %32 : vector<1x16x128xf32> to vector<16x128xf32>
      %34 = vector.shape_cast %31 : vector<16x128xf32> to vector<1x16x128xf32>
      tpu.vector_store %arg4[%c0_17, %c0_18, %c0_19], %34 {strides = array<i32>} : memref<1x16x128xf32, #tpu.memory_space<vmem>>, vector<1x16x128xf32>,
    } else {
    }
    %cst = arith.constant 0.000000e+00 : f32
    %3 = vector.broadcast %cst : f32 to vector<8x128xf32>
    %c0_i32_1 = arith.constant 0 : i32
    %c16_i32 = arith.constant 16 : i32
    %4 = arith.muli %c0_i32_1, %c16_i32 : i32
    %5 = tpu.assume_multiple %4, 16 : i32
    %6 = arith.index_cast %5 : i32 to index
    %c0 = arith.constant 0 : index
    %7 = vector.load %arg2[%6, %c0] : memref<16x128xf32, #tpu.memory_space<vmem>>, vector<16x128xf32>
    %8 = arith.index_cast %5 : i32 to index
    %c0_2 = arith.constant 0 : index
    %9 = vector.load %arg3[%8, %c0_2] : memref<16x128xf32, #tpu.memory_space<vmem>>, vector<16x128xf32>
    %10 = arith.subf %7, %9 : vector<16x128xf32>
    %11 = arith.mulf %10, %10 : vector<16x128xf32>
    %12 = vector.shape_cast %11 : vector<16x128xf32> to vector<2x8x128xf32>
    %cst_3 = arith.constant dense<0.000000e+00> : vector<8x128xf32>
    %13 = vector.multi_reduction <add>, %12, %cst_3 [0] : vector<2x8x128xf32> to vector<8x128xf32>
    %14 = arith.addf %3, %13 : vector<8x128xf32>
    %15 = math.absf %10 : vector<16x128xf32>
    %16 = vector.shape_cast %15 : vector<16x128xf32> to vector<2x8x128xf32>
    %cst_4 = arith.constant dense<0.000000e+00> : vector<8x128xf32>
    %17 = vector.multi_reduction <add>, %16, %cst_4 [0] : vector<2x8x128xf32> to vector<8x128xf32>
    %18 = arith.addf %3, %17 : vector<8x128xf32>
    %c1_i32 = arith.constant 1 : i32
    %c0_5 = arith.constant 0 : index
    %c0_6 = arith.constant 0 : index
    %c0_7 = arith.constant 0 : index
    %19 = vector.load %arg4[%c0_5, %c0_6, %c0_7] : memref<1x16x128xf32, #tpu.memory_space<vmem>>, vector<1x8x128xf32>
    %20 = vector.shape_cast %19 : vector<1x8x128xf32> to vector<8x128xf32>
    %21 = arith.addf %20, %14 : vector<8x128xf32>
    %c0_8 = arith.constant 0 : index
    %c0_9 = arith.constant 0 : index
    %c0_10 = arith.constant 0 : index
    %22 = vector.load %arg4[%c0_8, %c0_9, %c0_10] : memref<1x16x128xf32, #tpu.memory_space<vmem>>, vector<1x8x128xf32>
    %23 = vector.shape_cast %22 : vector<1x8x128xf32> to vector<8x128xf32>
    %24 = vector.shape_cast %21 : vector<8x128xf32> to vector<1x8x128xf32>
    tpu.vector_store %arg4[%c0_8, %c0_9, %c0_10], %24 {strides = array<i32>} : memref<1x16x128xf32, #tpu.memory_space<vmem>>, vector<1x8x128xf32>,
    %c0_11 = arith.constant 0 : index
    %c8 = arith.constant 8 : index
    %c0_12 = arith.constant 0 : index
    %25 = vector.load %arg4[%c0_11, %c8, %c0_12] : memref<1x16x128xf32, #tpu.memory_space<vmem>>, vector<1x8x128xf32>
    %26 = vector.shape_cast %25 : vector<1x8x128xf32> to vector<8x128xf32>
    %27 = arith.addf %26, %18 : vector<8x128xf32>
    %c0_13 = arith.constant 0 : index
    %c8_14 = arith.constant 8 : index
    %c0_15 = arith.constant 0 : index
    %28 = vector.load %arg4[%c0_13, %c8_14, %c0_15] : memref<1x16x128xf32, #tpu.memory_space<vmem>>, vector<1x8x128xf32>
    %29 = vector.shape_cast %28 : vector<1x8x128xf32> to vector<8x128xf32>
    %30 = vector.shape_cast %27 : vector<8x128xf32> to vector<1x8x128xf32>
    tpu.vector_store %arg4[%c0_13, %c8_14, %c0_15], %30 {strides = array<i32>} : memref<1x16x128xf32, #tpu.memory_space<vmem>>, vector<1x8x128xf32>,
    return
  }
  func.func @transform_0(%arg0: i32, %arg1: i32) -> (i32, i32) {
    %c1_i32 = arith.constant 1 : i32
    %0 = arith.muli %arg0, %c1_i32 : i32
    %1 = arith.addi %0, %arg1 : i32
    %c0_i32 = arith.constant 0 : i32
    %2 = arith.minsi %1, %c0_i32 : i32
    %c0_i32_0 = arith.constant 0 : i32
    %c0_i32_1 = arith.constant 0 : i32
    return %2, %c0_i32_0 : i32, i32
  }
  func.func @transform_1(%arg0: i32, %arg1: i32) -> (i32, i32) {
    %c1_i32 = arith.constant 1 : i32
    %0 = arith.muli %arg0, %c1_i32 : i32
    %1 = arith.addi %0, %arg1 : i32
    %c0_i32 = arith.constant 0 : i32
    %2 = arith.minsi %1, %c0_i32 : i32
    %c0_i32_0 = arith.constant 0 : i32
    %c0_i32_1 = arith.constant 0 : i32
    return %2, %c0_i32_0 : i32, i32
  }
  func.func @transform_2(%arg0: i32, %arg1: i32) -> (i32, i32, i32) {
    %c0_i32 = arith.constant 0 : i32
    %c0_i32_0 = arith.constant 0 : i32
    %c0_i32_1 = arith.constant 0 : i32
    return %arg0, %c0_i32, %c0_i32_0 : i32, i32, i32
  }
}

</mosaic_0001>

<bundles_post_ra>
// kernel: _mse_mae.1
= control target key start
LH: loop header
LB: loop body
LE: loop exit
PB: predicated region body
PF: predicated region fallthrough
CT: control target
= control target key end

     0   :  { %7 = vsyncpa [#allocation3], 0  ;;  %s197_s0 = inlined_call_operand.hbm [shape: f32[16,128], index: 0, kind: input, shape index: {}]   ;;  %s198_s1 = inlined_call_operand.hbm [shape: f32[16,128], index: 1, kind: input, shape index: {}]   ;;  %s199_s2 = inlined_call_operand.vmem [shape: f32[1,16,128], index: 2, kind: output, shape index: {}]  }
   0x1   :  { %8 = vsyncpa [#allocation5], 0  ;;  %s148_s9 = smov [#allocation2]   ;;  %s100_s13 = scalar_lea.hbm %s197_s0, 256 }
   0x2   :  { %s20_s10 = sshll.u32 %s148_s9, 4  ;;  %p101_p0 = scmp.ne.s32.totalorder %s197_s0, %s100_s13  ;;  %s21_s10 = int_to_ptr.vmem [resolvable:$true] %s20_s10 }
   0x3   :  { %p104_p1 = scmp.lt.u32.totalorder %s100_s13, %s197_s0 }
   0x5   :  { %p106_p2 = pnand %p104_p1, %p101_p0 }
   0x7   :  { %109 = shalt.err (!%p106_p2)
}
   0x8   :  { %s110_s18 = scalar_lea.vmem %s21_s10, 256  ;;  %p115_p4 = scmp.lt.s32.totalorder %s21_s10, %s21_s10 }
   0x9   :  { %p111_p3 = scmp.ne.s32.totalorder %s21_s10, %s110_s18  ;;  %p116_p5 = scmp.lt.s32.totalorder %s110_s18, %s110_s18 }
   0xb   :  { %p117_p6 = por %p116_p5, %p115_p4 }
   0xd   :  { %p118_p7 = pnand %p117_p6, %p111_p3 }
   0xf   :  { %121 = shalt.err (!%p118_p7)
}
  0x10   :  { %s149_s19 = smov 128   ;;  %s150_s20 = smov 8  }
  0x11   :  { %26 = dma.hbm_to_vmem [thread:$0]  %s197_s0, 256, %s21_s10, [#allocation3], %s149_s19, %s149_s19, %s150_s20  }
  0x12   :  { %s151_s23 = smov [#allocation4]   ;;  %s122_s27 = scalar_lea.hbm %s198_s1, 256 }
  0x13   :  { %s38_s24 = sshll.u32 %s151_s23, 4  ;;  %p123_p8 = scmp.ne.s32.totalorder %s198_s1, %s122_s27  ;;  %s39_s24 = int_to_ptr.vmem [resolvable:$true] %s38_s24 }
  0x14   :  { %p126_p9 = scmp.lt.u32.totalorder %s122_s27, %s198_s1 }
  0x16   :  { %p128_p10 = pnand %p126_p9, %p123_p8 }
  0x18   :  { %131 = shalt.err (!%p128_p10)
}
  0x19   :  { %s132_s4 = scalar_lea.vmem %s39_s24, 256  ;;  %p137_p12 = scmp.lt.s32.totalorder %s39_s24, %s39_s24 }
  0x1a   :  { %p133_p11 = scmp.ne.s32.totalorder %s39_s24, %s132_s4  ;;  %p138_p13 = scmp.lt.s32.totalorder %s132_s4, %s132_s4 }
  0x1c   :  { %p139_p0 = por %p138_p13, %p137_p12 }
  0x1e   :  { %p140_p1 = pnand %p139_p0, %p133_p11 }
  0x20   :  { %143 = shalt.err (!%p140_p1)
}
  0x21   :  { %44 = dma.hbm_to_vmem [thread:$0]  %s198_s1, 256, %s39_s24, [#allocation5], %s149_s19, %s149_s19, %s150_s20  }
  0x22   :  { %144 = dma.done.wait [#allocation3], 256  }
  0x23   :  { %145 = vsyncadd [#allocation3], 4294967040 }
  0x24   :  { %146 = dma.done.wait [#allocation5], 256  }
  0x25   :  { %147 = vsyncadd [#allocation5], 4294967040  ;;  %v65_v0 = vld [vmem:[#allocation2] sm:$0xff]  ;;  %v66_v1 = vld [vmem:[#allocation2 + $0x8] sm:$0xff] }
  0x26   :  { %v67_v2 = vld [vmem:[#allocation4] sm:$0xff]  ;;  %v68_v3 = vld [vmem:[#allocation4 + $0x8] sm:$0xff] }
  0x27   :  { %v69_v4 = vsub.f32 %v65_v0, %v67_v2  ;;  %v70_v5 = vsub.f32 %v66_v1, %v68_v3 }
  0x29   :  { %v71_v6 = vmul.f32 %v69_v4, %v69_v4  ;;  %v75_v7 = vand.u32 2147483647, %v69_v4  ;;  %v72_v8 = vmul.f32 %v70_v5, %v70_v5  ;;  %v76_v9 = vand.u32 2147483647, %v70_v5 }
  0x2b   :  { %v73_v10 = vadd.f32 %v72_v8, %v71_v6  ;;  %v77_v11 = vadd.f32 %v76_v9, %v75_v7 }
  0x2d   :  { %81 = vst [vmem:[%s199_s2] sm:$0xff] %v73_v10  ;;  %84 = vst [vmem:[%s199_s2 + $0x8] sm:$0xff] %v77_v11 }
  0x2e   :  { %89 = vsyncpa [#allocation3], 1 }
  0x2f   :  { %90 = vsyncpa [#allocation5], 1 }

</bundles_post_ra>
